<compile_context>
chip_gen: v7x
topology: tpu7x:2x2x1
jax: 0.10.0
libtpu: 0.0.40
codegen_flags: <defaults>
</compile_context>

<pallas_src>
import functools

import jax
import jax.numpy as jnp
from jax.experimental import pallas as pl
from jax.experimental.pallas import tpu as pltpu


def _round_up(v, m):
    return (v + m - 1) // m * m


def certify_cnn1d_kernel(x_ref, mask_ref, w1_ref, b1_ref, w2_ref, b2_ref,
                         out_ref, acc_ref, len_ref, *, t_total):
    # x_ref:   (TB, TT, E_pad) bf16     mask_ref: (TB, TT) f32
    # w1_ref:  (E_pad, H_pad)  bf16     b1_ref:   (1, H_pad) f32
    # w2_ref:  (H_pad, H_pad)  bf16     b2_ref:   (1, H_pad) f32
    # out_ref: (TB, H_pad) f32
    # acc_ref: (TB, H_pad) f32 scratch (pooled sum), len_ref: (TB, 1) f32 scratch (mask length)
    t = pl.program_id(1)
    tb, tt, e_pad = x_ref.shape
    h_pad = w1_ref.shape[1]

    @pl.when(t == 0)
    def _init():
        acc_ref[...] = jnp.zeros_like(acc_ref)
        len_ref[...] = jnp.zeros_like(len_ref)

    # lengths = sum(mask, -1); mask is zero-padded past the real T on the host.
    len_ref[...] += jnp.sum(mask_ref[...], axis=-1, keepdims=True)

    # First matmul, flattened to 2-D so the MXU gets M = TB*TT rows per push.
    x2d = x_ref[...].reshape(tb * tt, e_pad)
    h = jnp.dot(x2d, w1_ref[...], preferred_element_type=jnp.float32)
    h = jnp.maximum(h + b1_ref[...], 0.0)          # (TB*TT, H_pad) f32
    h3 = h.reshape(tb, tt, h_pad)

    # Rows past the true sequence length (introduced only by tile padding) must not
    # contribute relu(b1) to the pooled sum. Static no-op when TT divides T.
    if t_total % tt != 0:
        t_row = t * tt + jax.lax.broadcasted_iota(jnp.int32, (tt, 1), 0)
        h3 = h3 * (t_row < t_total).astype(jnp.float32)[None, :, :]

    acc_ref[...] += jnp.sum(h3, axis=1)            # (TB, H_pad)

    # TODO(synk): dropout(p=0.1) is identity at inference; training-mode dropout not implemented.
    @pl.when(t == pl.num_programs(1) - 1)
    def _finalize():
        inv_len = pl.reciprocal(len_ref[...], approx=True)   # EUP slot; keeps VALU free
        pooled = acc_ref[...] * inv_len                      # (TB, H_pad) f32
        out = jnp.dot(pooled.astype(jnp.bfloat16), w2_ref[...],
                      preferred_element_type=jnp.float32) + b2_ref[...]
        out_ref[...] = jnp.maximum(out, 0.0)


def certify_cnn1d_forward(x, mask, w1, b1, w2, b2, *, tb=None, tt=None):
    B, T, E = x.shape
    H = w1.shape[1]

    # Pad features to full 128-lane width; pad B/T up to tile multiples.
    E_pad = _round_up(E, 128)
    H_pad = _round_up(H, 128)
    if tb is None:
        tb = min(8, B)
    if tt is None:
        # bf16 x tile (double-buffered) + f32 activation stays well under the
        # 16 MiB (v5e) / 32 MiB (v6e, v7x) scoped-VMEM defaults.
        tt = min(512, _round_up(T, 8))
    B_pad = _round_up(B, tb)
    T_pad = _round_up(T, tt)

    xp = jnp.zeros((B_pad, T_pad, E_pad), jnp.bfloat16)
    xp = xp.at[:B, :T, :E].set(x.astype(jnp.bfloat16))
    maskp = jnp.zeros((B_pad, T_pad), jnp.float32).at[:B, :T].set(mask.astype(jnp.float32))
    w1p = jnp.zeros((E_pad, H_pad), jnp.bfloat16).at[:E, :H].set(w1.astype(jnp.bfloat16))
    b1p = jnp.zeros((1, H_pad), jnp.float32).at[0, :H].set(b1.astype(jnp.float32))
    w2p = jnp.zeros((H_pad, H_pad), jnp.bfloat16).at[:H, :H].set(w2.astype(jnp.bfloat16))
    b2p = jnp.zeros((1, H_pad), jnp.float32).at[0, :H].set(b2.astype(jnp.float32))

    grid = (B_pad // tb, T_pad // tt)
    kernel = functools.partial(certify_cnn1d_kernel, t_total=T)

    out_pad = pl.pallas_call(
        kernel,
        out_shape=jax.ShapeDtypeStruct((B_pad, H_pad), jnp.float32),
        grid_spec=pltpu.PrefetchScalarGridSpec(
            num_scalar_prefetch=0,
            grid=grid,
            in_specs=[
                pl.BlockSpec((tb, tt, E_pad), lambda b, t: (b, t, 0)),   # x tile
                pl.BlockSpec((tb, tt), lambda b, t: (b, t)),             # mask tile
                pl.BlockSpec((E_pad, H_pad), lambda b, t: (0, 0)),       # W1 (VMEM-resident)
                pl.BlockSpec((1, H_pad), lambda b, t: (0, 0)),           # b1
                pl.BlockSpec((H_pad, H_pad), lambda b, t: (0, 0)),       # W2
                pl.BlockSpec((1, H_pad), lambda b, t: (0, 0)),           # b2
            ],
            out_specs=pl.BlockSpec((tb, H_pad), lambda b, t: (b, 0)),
            scratch_shapes=[
                pltpu.VMEM((tb, H_pad), jnp.float32),   # pooled-sum accumulator
                pltpu.VMEM((tb, 1), jnp.float32),       # mask-length accumulator
            ],
        ),
        compiler_params=pltpu.CompilerParams(
            dimension_semantics=("parallel", "arbitrary"),
            vmem_limit_bytes=32 * 1024 * 1024,
        ),
    )(xp, maskp, w1p, b1p, w2p, b2p)

    return out_pad[:B, :H]


def reference_forward(x, mask, w1, b1, w2, b2):
    # Exact f32 reference for the module's forward semantics.
    lengths = jnp.sum(mask, axis=-1, keepdims=True)
    h = jnp.maximum(jnp.einsum("bte,eh->bth", x, w1) + b1, 0.0)
    pooled = jnp.sum(h, axis=1) / lengths
    return jnp.maximum(pooled @ w2 + b2, 0.0)


if __name__ == "__main__":
    # Small shapes consistent with the module: batch=2, seq=8, embedding=16, hidden=32.
    B, T, E, H = 2, 8, 16, 32

    key = jax.random.PRNGKey(0)
    k_x, k_w1, k_b1, k_w2, k_b2 = jax.random.split(key, 5)

    x = jax.random.normal(k_x, (B, T, E), dtype=jnp.float32)
    valid = jnp.array([T, T - 3], dtype=jnp.int32)
    mask = (jnp.arange(T)[None, :] < valid[:, None]).astype(jnp.float32)

    w1 = jax.random.normal(k_w1, (E, H), dtype=jnp.float32) * 0.1
    b1 = jax.random.normal(k_b1, (H,), dtype=jnp.float32) * 0.1
    w2 = jax.random.normal(k_w2, (H, H), dtype=jnp.float32) * 0.1
    b2 = jax.random.normal(k_b2, (H,), dtype=jnp.float32) * 0.1

    out = jax.block_until_ready(certify_cnn1d_forward(x, mask, w1, b1, w2, b2))
    ref = reference_forward(x, mask, w1, b1, w2, b2)

    assert out.shape == (B, H)
    # Loose tolerance: kernel uses bf16 MXU inputs + approx reciprocal vs. the exact-f32 reference.
    assert jnp.allclose(out, ref, atol=3e-2, rtol=3e-2), float(jnp.max(jnp.abs(out - ref)))

    print("KERNEL_OK")
</pallas_src>

<mosaic_0001>
module attributes {stable_mosaic.version = 11 : i64} {
  func.func @certify_cnn1d_kernel(%arg0: i32, %arg1: i32, %arg2: memref<2x8x128xbf16, #tpu.memory_space<vmem>>, %arg3: memref<2x8xf32, #tpu.memory_space<vmem>>, %arg4: memref<128x128xbf16, #tpu.memory_space<vmem>>, %arg5: memref<1x128xf32, #tpu.memory_space<vmem>>, %arg6: memref<128x128xbf16, #tpu.memory_space<vmem>>, %arg7: memref<1x128xf32, #tpu.memory_space<vmem>>, %arg8: memref<2x128xf32, #tpu.memory_space<vmem>>, %arg9: memref<2x128xf32, #tpu.memory_space<vmem>>, %arg10: memref<2x1xf32, #tpu.memory_space<vmem>>) attributes {dimension_semantics = [#tpu.dimension_semantics<parallel>, #tpu.dimension_semantics<arbitrary>], iteration_bounds = array<i64: 1, 1>, scalar_prefetch = 0 : i64, scratch_operands = 2 : i64, tpu.core_type = #tpu.core_type<tc>, window_params = [{transform_indices = @transform_0, window_bounds = array<i64: 2, 8, 128>}, {transform_indices = @transform_1, window_bounds = array<i64: 2, 8>}, {pipeline_mode = #tpu.pipeline_mode<synchronous>, transform_indices = @transform_2, window_bounds = array<i64: 128, 128>}, {pipeline_mode = #tpu.pipeline_mode<synchronous>, transform_indices = @transform_3, window_bounds = array<i64: 1, 128>}, {pipeline_mode = #tpu.pipeline_mode<synchronous>, transform_indices = @transform_4, window_bounds = array<i64: 128, 128>}, {pipeline_mode = #tpu.pipeline_mode<synchronous>, transform_indices = @transform_5, window_bounds = array<i64: 1, 128>}, {transform_indices = @transform_6, window_bounds = array<i64: 2, 128>}]} {
    %c0_i32 = arith.constant 0 : i32
    %0 = arith.cmpi eq, %arg1, %c0_i32 : i32
    %1 = arith.extui %0 : i1 to i32
    %c0_i32_0 = arith.constant 0 : i32
    %2 = arith.cmpi ne, %1, %c0_i32_0 : i32
    scf.if %2 {
      %cst_22 = arith.constant 0.000000e+00 : f32
      %26 = vector.broadcast %cst_22 : f32 to vector<2x128xf32>
      %c0_23 = arith.constant 0 : index
      %c0_24 = arith.constant 0 : index
      %27 = vector.load %arg9[%c0_23, %c0_24] : memref<2x128xf32, #tpu.memory_space<vmem>>, vector<2x128xf32>
      tpu.vector_store %arg9[%c0_23, %c0_24], %26 {strides = array<i32>} : memref<2x128xf32, #tpu.memory_space<vmem>>, vector<2x128xf32>,
      %cst_25 = arith.constant 0.000000e+00 : f32
      %28 = vector.broadcast %cst_25 : f32 to vector<2x1xf32>
      %c0_26 = arith.constant 0 : index
      %c0_27 = arith.constant 0 : index
      %29 = vector.load %arg10[%c0_26, %c0_27] : memref<2x1xf32, #tpu.memory_space<vmem>>, vector<2x1xf32>
      tpu.vector_store %arg10[%c0_26, %c0_27], %28 {strides = array<i32>} : memref<2x1xf32, #tpu.memory_space<vmem>>, vector<2x1xf32>,
    } else {
    }
    %c0 = arith.constant 0 : index
    %c0_1 = arith.constant 0 : index
    %3 = vector.load %arg10[%c0, %c0_1] : memref<2x1xf32, #tpu.memory_space<vmem>>, vector<2x1xf32>
    %c0_2 = arith.constant 0 : index
    %c0_3 = arith.constant 0 : index
    %4 = vector.load %arg3[%c0_2, %c0_3] : memref<2x8xf32, #tpu.memory_space<vmem>>, vector<2x8xf32>
    %cst = arith.constant dense<0.000000e+00> : vector<2xf32>
    %5 = vector.multi_reduction <add>, %4, %cst [1] : vector<2x8xf32> to vector<2xf32>
    %6 = vector.shape_cast %5 : vector<2xf32> to vector<2x1xf32>
    %7 = arith.addf %3, %6 : vector<2x1xf32>
    %c0_4 = arith.constant 0 : index
    %c0_5 = arith.constant 0 : index
    %8 = vector.load %arg10[%c0_4, %c0_5] : memref<2x1xf32, #tpu.memory_space<vmem>>, vector<2x1xf32>
    tpu.vector_store %arg10[%c0_4, %c0_5], %7 {strides = array<i32>} : memref<2x1xf32, #tpu.memory_space<vmem>>, vector<2x1xf32>,
    %c0_6 = arith.constant 0 : index
    %c0_7 = arith.constant 0 : index
    %c0_8 = arith.constant 0 : index
    %9 = vector.load %arg2[%c0_6, %c0_7, %c0_8] : memref<2x8x128xbf16, #tpu.memory_space<vmem>>, vector<2x8x128xbf16>
    %10 = vector.shape_cast %9 : vector<2x8x128xbf16> to vector<16x128xbf16>
    %c0_9 = arith.constant 0 : index
    %c0_10 = arith.constant 0 : index
    %11 = vector.load %arg4[%c0_9, %c0_10] : memref<128x128xbf16, #tpu.memory_space<vmem>>, vector<128x128xbf16>
    %cst_11 = arith.constant dense<0.000000e+00> : vector<16x128xf32>
    %12 = tpu.matmul %10, %11, %cst_11 {dimension_numbers = #tpu.dot_dimension_numbers<[1], [0], [0], [1], [0, 0, 1, 1], [], []>} : vector<16x128xbf16>, vector<128x128xbf16>, vector<16x128xf32> -> vector<16x128xf32>
    %c0_12 = arith.constant 0 : index
    %c0_13 = arith.constant 0 : index
    %13 = vector.load %arg5[%c0_12, %c0_13] : memref<1x128xf32, #tpu.memory_space<vmem>>, vector<1x128xf32>
    %14 = vector.broadcast %13 : vector<1x128xf32> to vector<16x128xf32>
    %15 = arith.addf %12, %14 : vector<16x128xf32>
    %cst_14 = arith.constant 0.000000e+00 : f32
    %16 = vector.broadcast %cst_14 : f32 to vector<16x128xf32>
    %17 = arith.maximumf %15, %16 : vector<16x128xf32>
    %18 = vector.shape_cast %17 : vector<16x128xf32> to vector<2x8x128xf32>
    %c0_15 = arith.constant 0 : index
    %c0_16 = arith.constant 0 : index
    %19 = vector.load %arg9[%c0_15, %c0_16] : memref<2x128xf32, #tpu.memory_space<vmem>>, vector<2x128xf32>
    %cst_17 = arith.constant dense<0.000000e+00> : vector<2x128xf32>
    %20 = vector.multi_reduction <add>, %18, %cst_17 [1] : vector<2x8x128xf32> to vector<2x128xf32>
    %21 = arith.addf %19, %20 : vector<2x128xf32>
    %c0_18 = arith.constant 0 : index
    %c0_19 = arith.constant 0 : index
    %22 = vector.load %arg9[%c0_18, %c0_19] : memref<2x128xf32, #tpu.memory_space<vmem>>, vector<2x128xf32>
    tpu.vector_store %arg9[%c0_18, %c0_19], %21 {strides = array<i32>} : memref<2x128xf32, #tpu.memory_space<vmem>>, vector<2x128xf32>,
    %c0_i32_20 = arith.constant 0 : i32
    %23 = arith.cmpi eq, %arg1, %c0_i32_20 : i32
    %24 = arith.extui %23 : i1 to i32
    %c0_i32_21 = arith.constant 0 : i32
    %25 = arith.cmpi ne, %24, %c0_i32_21 : i32
    scf.if %25 {
      %c0_22 = arith.constant 0 : index
      %c0_23 = arith.constant 0 : index
      %26 = vector.load %arg10[%c0_22, %c0_23] : memref<2x1xf32, #tpu.memory_space<vmem>>, vector<2x1xf32>
      %27 = tpu.reciprocal %26 {approx = true} : vector<2x1xf32> -> vector<2x1xf32>
      %c0_24 = arith.constant 0 : index
      %c0_25 = arith.constant 0 : index
      %28 = vector.load %arg9[%c0_24, %c0_25] : memref<2x128xf32, #tpu.memory_space<vmem>>, vector<2x128xf32>
      %29 = vector.broadcast %27 : vector<2x1xf32> to vector<2x128xf32>
      %30 = arith.mulf %28, %29 : vector<2x128xf32>
      %31 = arith.truncf %30 : vector<2x128xf32> to vector<2x128xbf16>
      %c0_26 = arith.constant 0 : index
      %c0_27 = arith.constant 0 : index
      %32 = vector.load %arg6[%c0_26, %c0_27] : memref<128x128xbf16, #tpu.memory_space<vmem>>, vector<128x128xbf16>
      %cst_28 = arith.constant dense<0.000000e+00> : vector<2x128xf32>
      %33 = tpu.matmul %31, %32, %cst_28 {dimension_numbers = #tpu.dot_dimension_numbers<[1], [0], [0], [1], [0, 0, 1, 1], [], []>} : vector<2x128xbf16>, vector<128x128xbf16>, vector<2x128xf32> -> vector<2x128xf32>
      %c0_29 = arith.constant 0 : index
      %c0_30 = arith.constant 0 : index
      %34 = vector.load %arg7[%c0_29, %c0_30] : memref<1x128xf32, #tpu.memory_space<vmem>>, vector<1x128xf32>
      %35 = vector.broadcast %34 : vector<1x128xf32> to vector<2x128xf32>
      %36 = arith.addf %33, %35 : vector<2x128xf32>
      %cst_31 = arith.constant 0.000000e+00 : f32
      %37 = vector.broadcast %cst_31 : f32 to vector<2x128xf32>
      %38 = arith.maximumf %36, %37 : vector<2x128xf32>
      %c0_32 = arith.constant 0 : index
      %c0_33 = arith.constant 0 : index
      %39 = vector.load %arg8[%c0_32, %c0_33] : memref<2x128xf32, #tpu.memory_space<vmem>>, vector<2x128xf32>
      tpu.vector_store %arg8[%c0_32, %c0_33], %38 {strides = array<i32>} : memref<2x128xf32, #tpu.memory_space<vmem>>, vector<2x128xf32>,
    } else {
    }
    return
  }
  func.func @transform_0(%arg0: i32, %arg1: i32) -> (i32, i32, i32) {
    %c0_i32 = arith.constant 0 : i32
    %c0_i32_0 = arith.constant 0 : i32
    return %arg0, %arg1, %c0_i32 : i32, i32, i32
  }
  func.func @transform_1(%arg0: i32, %arg1: i32) -> (i32, i32) {
    %c0_i32 = arith.constant 0 : i32
    return %arg0, %arg1 : i32, i32
  }
  func.func @transform_2(%arg0: i32, %arg1: i32) -> (i32, i32) {
    %c0_i32 = arith.constant 0 : i32
    %c0_i32_0 = arith.constant 0 : i32
    %c0_i32_1 = arith.constant 0 : i32
    return %c0_i32, %c0_i32_0 : i32, i32
  }
  func.func @transform_3(%arg0: i32, %arg1: i32) -> (i32, i32) {
    %c0_i32 = arith.constant 0 : i32
    %c0_i32_0 = arith.constant 0 : i32
    %c0_i32_1 = arith.constant 0 : i32
    return %c0_i32, %c0_i32_0 : i32, i32
  }
  func.func @transform_4(%arg0: i32, %arg1: i32) -> (i32, i32) {
    %c0_i32 = arith.constant 0 : i32
    %c0_i32_0 = arith.constant 0 : i32
    %c0_i32_1 = arith.constant 0 : i32
    return %c0_i32, %c0_i32_0 : i32, i32
  }
  func.func @transform_5(%arg0: i32, %arg1: i32) -> (i32, i32) {
    %c0_i32 = arith.constant 0 : i32
    %c0_i32_0 = arith.constant 0 : i32
    %c0_i32_1 = arith.constant 0 : i32
    return %c0_i32, %c0_i32_0 : i32, i32
  }
  func.func @transform_6(%arg0: i32, %arg1: i32) -> (i32, i32) {
    %c0_i32 = arith.constant 0 : i32
    %c0_i32_0 = arith.constant 0 : i32
    return %arg0, %c0_i32 : i32, i32
  }
}

</mosaic_0001>

<bundles_post_ra>
// kernel: tpu_custom_call.1
= control target key start
LH: loop header
LB: loop body
LE: loop exit
PB: predicated region body
PF: predicated region fallthrough
CT: control target
= control target key end

     0   :  { %11 = vsyncpa [#allocation5], 0  ;;  %s705_s0 = inlined_call_operand.hbm [shape: bf16[2,8,128], index: 0, kind: input, shape index: {}]   ;;  %s706_s1 = inlined_call_operand.vmem [shape: f32[2,8], index: 1, kind: input, shape index: {}]   ;;  %s707_s2 = inlined_call_operand.hbm [shape: bf16[128,128], index: 2, kind: input, shape index: {}]   ;;  %s708_s3 = inlined_call_operand.vmem [shape: f32[1,128], index: 3, kind: input, shape index: {}]   ;;  %s709_s4 = inlined_call_operand.hbm [shape: bf16[128,128], index: 4, kind: input, shape index: {}]   ;;  %s710_s5 = inlined_call_operand.vmem [shape: f32[1,128], index: 5, kind: input, shape index: {}]   ;;  %s711_s6 = inlined_call_operand.hbm [shape: f32[2,128], index: 6, kind: output, shape index: {}]  }
   0x1   :  { %12 = vsyncpa [#allocation8], 0 }
   0x2   :  { %13 = vsyncpa [#allocation6], 0  ;;  %s566_s21 = smov [#allocation7]   ;;  %s567_s23 = smov [#allocation4]  }
   0x3   :  { %s33_s22 = sshll.u32 %s566_s21, 4  ;;  %s19_s24 = sshll.u32 %s567_s23, 4  ;;  %s34_s22 = int_to_ptr.vmem [resolvable:$true] %s33_s22  ;;  %s610_s24 = int_to_ptr.vmem [resolvable:$true] %s19_s24 }
   0x4   :  { %s472_s27 = scalar_lea.hbm %s707_s2, 1024 }
   0x5   :  { %p473_p0 = scmp.ne.s32.totalorder %s707_s2, %s472_s27  ;;  %p476_p1 = scmp.lt.u32.totalorder %s472_s27, %s707_s2 }
   0x7   :  { %p478_p2 = pnand %p476_p1, %p473_p0 }
   0x9   :  { %481 = shalt.err (!%p478_p2)
}
   0xa   :  { %s482_s8 = scalar_lea.vmem %s34_s22, 1024  ;;  %p487_p4 = scmp.lt.s32.totalorder %s34_s22, %s34_s22 }
   0xb   :  { %p483_p3 = scmp.ne.s32.totalorder %s34_s22, %s482_s8  ;;  %p488_p5 = scmp.lt.s32.totalorder %s482_s8, %s482_s8 }
   0xd   :  { %p489_p6 = por %p488_p5, %p487_p4 }
   0xf   :  { %p490_p7 = pnand %p489_p6, %p483_p3 }
  0x11   :  { %493 = shalt.err (!%p490_p7)
}
  0x12   :  { %s568_s9 = smov 64   ;;  %s569_s10 = smov 4  }
  0x13   :  { %39 = dma.hbm_to_vmem [thread:$0]  %s707_s2, 1024, %s34_s22, [#allocation8], %s568_s9, %s568_s9, %s569_s10  }
  0x14   :  { %s494_s15 = scalar_lea.hbm %s705_s0, 128 }
  0x15   :  { %p495_p8 = scmp.ne.s32.totalorder %s705_s0, %s494_s15  ;;  %p498_p9 = scmp.lt.u32.totalorder %s494_s15, %s705_s0 }
  0x17   :  { %p500_p10 = pnand %p498_p9, %p495_p8 }
  0x19   :  { %503 = shalt.err (!%p500_p10)
}
  0x1a   :  { %s504_s20 = scalar_lea.vmem %s610_s24, 128  ;;  %p509_p12 = scmp.lt.s32.totalorder %s610_s24, %s610_s24 }
  0x1b   :  { %p505_p11 = scmp.ne.s32.totalorder %s610_s24, %s504_s20  ;;  %p510_p13 = scmp.lt.s32.totalorder %s504_s20, %s504_s20 }
  0x1d   :  { %p511_p0 = por %p510_p13, %p509_p12 }
  0x1f   :  { %p512_p1 = pnand %p511_p0, %p505_p11 }
  0x21   :  { %515 = shalt.err (!%p512_p1)
}
  0x22   :  { %25 = dma.hbm_to_vmem [thread:$0]  %s705_s0, 128, %s610_s24, [#allocation5], %s568_s9, %s568_s9, %s569_s10  }
  0x23   :  { %s570_s22 = smov [#allocation9]   ;;  %s516_s27 = scalar_lea.hbm %s709_s4, 1024 }
  0x24   :  { %s47_s23 = sshll.u32 %s570_s22, 4  ;;  %p517_p2 = scmp.ne.s32.totalorder %s709_s4, %s516_s27  ;;  %s48_s23 = int_to_ptr.vmem [resolvable:$true] %s47_s23 }
  0x25   :  { %p520_p3 = scmp.lt.u32.totalorder %s516_s27, %s709_s4 }
  0x27   :  { %p522_p4 = pnand %p520_p3, %p517_p2 }
  0x29   :  { %525 = shalt.err (!%p522_p4)
}
  0x2a   :  { %s526_s8 = scalar_lea.vmem %s48_s23, 1024  ;;  %p531_p6 = scmp.lt.s32.totalorder %s48_s23, %s48_s23 }
  0x2b   :  { %p527_p5 = scmp.ne.s32.totalorder %s48_s23, %s526_s8  ;;  %p532_p7 = scmp.lt.s32.totalorder %s526_s8, %s526_s8 }
  0x2d   :  { %p533_p8 = por %p532_p7, %p531_p6 }
  0x2f   :  { %p534_p9 = pnand %p533_p8, %p527_p5 }
  0x31   :  { %537 = shalt.err (!%p534_p9)
}
  0x32   :  { %53 = dma.hbm_to_vmem [thread:$0]  %s709_s4, 1024, %s48_s23, [#allocation8], %s568_s9, %s568_s9, %s569_s10  }
  0x33   :  { %560 = dma.done.wait [#allocation5], 128  }
  0x34   :  { %561 = vsyncadd [#allocation5], 4294967168 }
  0x35   :  { %562 = dma.done.wait [#allocation8], 2048  }
  0x36   :  { %563 = vsyncadd [#allocation8], 4294965248  ;;  %vm71_vm0 = vcmask 1024   ;;  %v571_v0 = vmov 0.0   ;;  %vm572_vm1 = vmmov 0   ;;  %vm75_vm2 = vcmask 58368  }
  0x37   :  { %403 = vmatprep.subr.bf16.mxu0 %v571_v0  ;;  %70 = vst [vmem:[#allocation2] sm:$0x3] %v571_v0  ;;  %419 = vmatprep.mubr.msk.bf16.mxu0 %vm572_vm1, %v571_v0  ;;  %72 = vst.msk [vmem:[#allocation3] sm:$0x3] %vm71_vm0, %v571_v0  ;;  %v74_v1 = vld [vmem:[%s706_s1] sm:$0x3] }
  0x38   :  { %423 = vmatprep.subr.bf16.mxu1 %v571_v0  ;;  %439 = vmatprep.mubr.msk.bf16.mxu1 %vm572_vm1, %v571_v0  ;;  %v76_v2 = vsel %vm75_vm2, %v74_v1, 0.0  ;;  %v453_v3 = vld [vmem:[#allocation7] sm:$0xff]   ;;  %v454_v4 = vld [vmem:[#allocation7 + $0x8] sm:$0xff]   ;;  %v455_v5 = vld [vmem:[#allocation7 + $0x10] sm:$0xff]   ;;  %v573_v9 = vmov 0   ;;  %vm219_vm3 = vcmask 1041409  }
  0x39   :  { %77 = vadd.xlane.f32.xlu0 %v76_v2  ;;  %404 = vmatpush3.bf16.msra.mxu0 %v453_v3  ;;  %v456_v6 = vld [vmem:[#allocation7 + $0x18] sm:$0xff]   ;;  %v457_v7 = vld [vmem:[#allocation7 + $0x20] sm:$0xff]   ;;  %v458_v8 = vld [vmem:[#allocation7 + $0x28] sm:$0xff]   ;;  %s574_s12 = smov [#allocation10]  }
  0x3a   :  { %405 = vmatprep.subr.bf16.mxu0 %v571_v0  ;;  %452 = vset.pattern.permute.xlu0 %v573_v9  ;;  %v459_v10 = vld [vmem:[#allocation7 + $0x30] sm:$0xff]   ;;  %v460_v11 = vld [vmem:[#allocation7 + $0x38] sm:$0xff]   ;;  %v462_v13 = vld [vmem:[#allocation9] sm:$0xff]   ;;  %s356_s13 = sshll.u32 %s574_s12, 4  ;;  %s357_s13 = int_to_ptr.vmem [resolvable:$true] %s356_s13 }
  0x3b   :  { %v461_v12 = vld [vmem:[#allocation4] sm:$0xff]   ;;  %424 = vmatpush3.bf16.msra.mxu1 %v462_v13  ;;  %v463_v14 = vld [vmem:[#allocation9 + $0x8] sm:$0xff]   ;;  %v464_v16 = vld [vmem:[#allocation9 + $0x10] sm:$0xff]   ;;  %s538_s14 = scalar_lea.vmem %s357_s13, 32  ;;  %p543_p11 = scmp.lt.s32.totalorder %s357_s13, %s357_s13 }
  0x3c   :  { %425 = vmatprep.subr.bf16.mxu1 %v571_v0  ;;  %v465_v19 = vld [vmem:[#allocation9 + $0x18] sm:$0xff]   ;;  %v466_v20 = vld [vmem:[#allocation9 + $0x20] sm:$0xff]   ;;  %v467_v22 = vld [vmem:[#allocation9 + $0x28] sm:$0xff]   ;;  %p539_p10 = scmp.ne.s32.totalorder %s357_s13, %s538_s14  ;;  %p544_p12 = scmp.lt.s32.totalorder %s538_s14, %s538_s14 }
  0x3d   :  { %406 = vmatpush3.bf16.msra.mxu0 %v454_v4  ;;  %v468_v23 = vld [vmem:[#allocation9 + $0x30] sm:$0xff]   ;;  %v469_v25 = vld [vmem:[#allocation9 + $0x38] sm:$0xff]  }
  0x3e   :  { %407 = vmatprep.subr.bf16.mxu0 %v571_v0  ;;  %v73_v15 = vld [vmem:[#allocation3] sm:$0x3]  ;;  %v366_v26 = vld [vmem:[%s708_s3] ss:$0 sm:$0xff]  ;;  %p545_p13 = por %p544_p12, %p543_p11 }
  0x3f   :  { %426 = vmatpush3.bf16.msra.mxu1 %v463_v14  ;;  %v204_v46 = vld [vmem:[#allocation2] sm:$0x3] }
  0x40   :  { %427 = vmatprep.subr.bf16.mxu1 %v571_v0  ;;  %v376_v54 = vld [vmem:[%s710_s5] ss:$0 sm:$0xff]  ;;  %p546_p0 = pnand %p545_p13, %p539_p10 }
  0x41   :  { %408 = vmatpush3.bf16.msra.mxu0 %v455_v5 }
  0x42   :  { %409 = vmatprep.subr.bf16.mxu0 %v571_v0 }
  0x43   :  { %428 = vmatpush3.bf16.msra.mxu1 %v464_v16 }
  0x44   :  { %429 = vmatprep.subr.bf16.mxu1 %v571_v0 }
  0x45   :  { %410 = vmatpush3.bf16.msra.mxu0 %v456_v6 }
  0x46   :  { %411 = vmatprep.subr.bf16.mxu0 %v571_v0 }
  0x47   :  { %430 = vmatpush3.bf16.msra.mxu1 %v465_v19 }
  0x48   :  { %431 = vmatprep.subr.bf16.mxu1 %v571_v0 }
  0x49   :  { %412 = vmatpush3.bf16.msra.mxu0 %v457_v7 }
  0x4a   :  { %413 = vmatprep.subr.bf16.mxu0 %v571_v0 }
  0x4b   :  { %432 = vmatpush3.bf16.msra.mxu1 %v466_v20 }
  0x4c   :  { %433 = vmatprep.subr.bf16.mxu1 %v571_v0 }
  0x4d   :  { %414 = vmatpush3.bf16.msra.mxu0 %v458_v8 }
  0x4e   :  { %415 = vmatprep.subr.bf16.mxu0 %v571_v0 }
  0x4f   :  { %434 = vmatpush3.bf16.msra.mxu1 %v467_v22 }
  0x50   :  { %435 = vmatprep.subr.bf16.mxu1 %v571_v0 }
  0x51   :  { %416 = vmatpush3.bf16.msra.mxu0 %v459_v10 }
  0x52   :  { %417 = vmatprep.subr.bf16.mxu0 %v571_v0 }
  0x53   :  { %436 = vmatpush3.bf16.msra.mxu1 %v468_v23 }
  0x54   :  { %437 = vmatprep.subr.bf16.mxu1 %v571_v0 }
  0x55   :  { %418 = vmatpush3.bf16.msra.mxu0 %v460_v11 }
  0x57   :  { %438 = vmatpush3.bf16.msra.mxu1 %v469_v25 }
  0x58   :  { %420 = vmatmul.mubr.bf16.vlgmr.msra.gmra.mrb[0].mxu0 %v461_v12 }
  0xc6   :  { %v78_v17 = vpop.xlane.xlu0 %77 }
  0xc7   :  { %v79_v18 = vadd.f32 %v78_v17, %v73_v15 }
  0xc9   :  { %81 = vst.msk [vmem:[#allocation3] sm:$0x3] %vm71_vm0, %v79_v18 }
  0xd0   :  { %v227_v21 = vld [vmem:[#allocation3] sm:$0x3] }
  0xd1   :  { %470 = vrcp.f32 %v227_v21 }
  0xdb   :  { %v471_v24 = vpop.eup %470 }
  0xdc   :  { %232 = vperm.xlu0 %452, %v471_v24  }
 0x12b   :  { %v195_v27 = vpop.f32.mrb[0].mxu0 }
 0x12c   :  { %v196_v28 = vadd.f32 %v366_v26, %v195_v27  ;;  %v421_v29 = vpop.f32.mrb[1].mxu0 }
 0x12d   :  { %v198_v30 = vpop.f32.mrb[2].mxu0 }
 0x12e   :  { %v202_v31 = vmax.f32 %v196_v28, 0.0  ;;  %v199_v32 = vadd.f32 %v366_v26, %v198_v30  ;;  %v422_v33 = vpop.f32.mrb[3].mxu0 }
 0x130   :  { %v205_v34 = vrot.slane %v202_v31, 4  ;;  %v203_v35 = vmax.f32 %v199_v32, 0.0 }
 0x132   :  { %v206_v36 = vadd.f32 %v205_v34, %v202_v31  ;;  %v211_v37 = vrot.slane %v203_v35, 4 }
 0x134   :  { %v207_v38 = vrot.slane %v206_v36, 2  ;;  %v212_v39 = vadd.f32 %v211_v37, %v203_v35 }
 0x136   :  { %v208_v40 = vadd.f32 %v207_v38, %v206_v36  ;;  %v213_v41 = vrot.slane %v212_v39, 2 }
 0x138   :  { %v209_v42 = vrot.slane %v208_v40, 1  ;;  %v214_v43 = vadd.f32 %v213_v41, %v212_v39 }
 0x13a   :  { %v210_v44 = vadd.f32 %v209_v42, %v208_v40  ;;  %v215_v45 = vrot.slane %v214_v43, 1 }
 0x13c   :  { %v216_v47 = vadd.f32 %v215_v45, %v214_v43 }
 0x13e   :  { %v220_v48 = vsel %vm219_vm3, %v216_v47, %v210_v44 }
 0x13f   :  { %v222_v49 = vadd.f32 %v220_v48, %v204_v46 }
 0x141   :  { %223 = vst [vmem:[#allocation2] sm:$0x3] %v222_v49 }
 0x148   :  { %v229_v51 = vld [vmem:[#allocation2] sm:$0x3] }
 0x15b   :  { %v233_v50 = vpop.permute.xlu0 %232 }
 0x15c   :  { %v235_v52 = vmul.f32 %v233_v50, %v229_v51 }
 0x15e   :  { %v236_v53 = vpack.c.bf16 %v235_v52, %v235_v52 }
 0x160   :  { %440 = vmatmul.mubr.bf16.vlgmr.msra.gmra.mrb[0].mxu1 %v236_v53 }
 0x233   :  { %v342_v55 = vpop.f32.mrb[0].mxu1 }
 0x234   :  { %v343_v56 = vadd.f32 %v376_v54, %v342_v55  ;;  %v441_v57 = vpop.f32.mrb[1].mxu1 }
 0x235   :  { %v345_v58 = vpop.f32.mrb[2].mxu1 }
 0x236   :  { %v348_v59 = vmax.f32 %v343_v56, 0.0  ;;  %v442_v60 = vpop.f32.mrb[3].mxu1 }
 0x238   :  { %349 = vst [vmem:[#allocation10] sm:$0x3] %v348_v59 }
 0x239   :  { %549 = shalt.err (!%p546_p0)
}
 0x23a   :  { %s550_s5 = scalar_lea.hbm %s711_s6, 32 }
 0x23b   :  { %p551_p1 = scmp.ne.s32.totalorder %s711_s6, %s550_s5  ;;  %p554_p2 = scmp.lt.u32.totalorder %s550_s5, %s711_s6 }
 0x23d   :  { %p556_p3 = pnand %p554_p2, %p551_p1 }
 0x23f   :  { %559 = shalt.err (!%p556_p3)
}
 0x240   :  { %359 = dma.vmem_to_hbm [thread:$0]  %s357_s13, 32, %s711_s6, [#allocation6]  }
 0x241   :  { %564 = dma.done.wait [#allocation6], 32  }
 0x242   :  { %565 = vsyncadd [#allocation6], 4294967264 }
 0x243   :  { %363 = vsyncpa [#allocation5], 1 }
 0x244   :  { %364 = vsyncpa [#allocation8], 1 }
 0x245   :  { %365 = vsyncpa [#allocation6], 1 }

</bundles_post_ra>
